<compile_context>
chip_gen: v5e
topology: v5e:2x2
jax: 0.10.0
libtpu: 0.0.40
codegen_flags: <defaults>
</compile_context>

<pallas_src>
import jax
import jax.numpy as jnp
from jax.experimental import pallas as pl
from jax.experimental.pallas import tpu as pltpu

_LANE = 128
_MIN_PALLAS_BYTES = 1 << 20  # below ~1 MiB, a plain (XLA-fusable) add wins


def _add_kernel(x_ref, r_ref, o_ref):
    # Elementwise add on the VPU over the whole VMEM tile.
    o_ref[...] = x_ref[...] + r_ref[...]


def _chip_profile():
    """Return (tensorcores_per_chip, target_block_bytes), conservative per generation."""
    try:
        kind = jax.devices()[0].device_kind.lower()
    except Exception:  # pragma: no cover - defensive, e.g. no devices visible yet
        kind = ""
    if "v5e" in kind or "v5 lite" in kind or "v5lite" in kind:
        # v5e: 1 TC, 16 MiB default scoped VMEM -> 2 MiB blocks (3 ops x 2 bufs = 12 MiB).
        return 1, 2 * 1024 * 1024
    if "v6" in kind:
        # v6e: 1 TC, 32 MiB default scoped VMEM -> 4 MiB blocks (24 MiB total).
        return 1, 4 * 1024 * 1024
    if "7" in kind:
        # v7x: 2 TCs, 64 MiB physical / 32 MiB default scoped -> 4 MiB blocks (24 MiB).
        return 2, 4 * 1024 * 1024
    if "v4" in kind or "v5p" in kind or "v5" in kind:
        # Megacore generations (2 TCs), keep blocks conservative.
        return 2, 2 * 1024 * 1024
    # Unknown chip: single-TC assumption, conservative block size.
    return 1, 2 * 1024 * 1024


def _pick_block_rows(rows, sublane, target_rows, num_cores):
    """Block height (multiple of `sublane`, or full extent) and grid step count.

    Single-TC chips are never force-split (per-step overhead is pure loss there);
    dual-TC chips get a grid count that is a multiple of num_cores for load balance.
    """
    if rows <= sublane:
        return rows, 1

    block = min(target_rows, rows)
    block = max(sublane, (block // sublane) * sublane)
    grid = pl.cdiv(rows, block)

    if num_cores > 1:
        # Keep the grid a multiple of num_cores (and >= num_cores) so both
        # TensorCores stay busy and balanced.
        want = max(num_cores, pl.cdiv(grid, num_cores) * num_cores)
        b = pl.cdiv(rows, want)
        b = max(sublane, pl.cdiv(b, sublane) * sublane)
        g = pl.cdiv(rows, b)
        if g >= num_cores and g % num_cores == 0:
            block, grid = b, g

    if block >= rows or grid <= 1:
        return rows, 1
    return block, grid


def daf_forward(x, residual, *, min_pallas_bytes=_MIN_PALLAS_BYTES):
    """DirectAddFuse: return x + residual (exact semantics of torch `x + residual`).

    Falls back to a plain JAX add for tiny or lane-ragged tensors, where the
    custom-call launch / partial-lane stores would only cost performance.
    """
    assert x.shape == residual.shape, "DAF expects matching shapes"
    assert x.dtype == residual.dtype, "DAF expects matching dtypes"

    orig_shape = x.shape
    total = x.size
    if total == 0 or x.ndim == 0:
        return x + residual

    elem_bytes = jnp.dtype(x.dtype).itemsize

    # Tiny tensors: launch + grid-step overhead dominates, and XLA fuses the add
    # into neighbouring ops for free.
    if total * elem_bytes < min_pallas_bytes:
        return x + residual

    # Ragged total: a lane-dense (rows, 128) slab is impossible without padding
    # (an extra HBM pass), and narrow-lane blocks mean masked partial stores —
    # XLA's own add is already at the roofline for this case.
    if total % _LANE != 0:
        return x + residual

    num_cores, target_block_bytes = _chip_profile()
    # Minimum sublane multiple per dtype (f32: 8, bf16: 16, int8/fp8: 32).
    sublane = {4: 8, 2: 16, 1: 32}.get(elem_bytes, 8)

    lanes = _LANE
    rows = total // lanes
    xf = x.reshape(rows, lanes)          # contiguous -> free reshape, no copy
    rf = residual.reshape(rows, lanes)

    target_rows = max(sublane, target_block_bytes // (lanes * elem_bytes))
    block_rows, grid = _pick_block_rows(rows, sublane, target_rows, num_cores)

    out2d = pl.pallas_call(
        _add_kernel,
        out_shape=jax.ShapeDtypeStruct((rows, lanes), x.dtype),
        grid_spec=pltpu.PrefetchScalarGridSpec(
            num_scalar_prefetch=0,
            grid=(grid,),
            in_specs=[
                pl.BlockSpec((block_rows, lanes), lambda i: (i, 0)),
                pl.BlockSpec((block_rows, lanes), lambda i: (i, 0)),
            ],
            out_specs=pl.BlockSpec((block_rows, lanes), lambda i: (i, 0)),
        ),
        compiler_params=pltpu.CompilerParams(
            dimension_semantics=("parallel",),
        ),
        # Note: no input_output_aliases — aliasing a non-donated input would make
        # XLA insert a defensive full copy (an extra HBM pass). Callers that truly
        # donate x at the jit boundary can add the alias themselves.
    )(xf, rf)

    return out2d.reshape(orig_shape)


if __name__ == "__main__":
    key = jax.random.PRNGKey(0)
    k1, k2, k3, k4, k5, k6 = jax.random.split(key, 6)

    # 1) Small NCHW shape consistent with the fusion module. Force the Pallas path
    #    (min_pallas_bytes=0) so the kernel itself is compiled and run, even though
    #    the default small-tensor cutoff would normally skip it.
    x = jax.random.normal(k1, (2, 4, 16, 16), dtype=jnp.float32)
    residual = jax.random.normal(k2, (2, 4, 16, 16), dtype=jnp.float32)
    y = jax.block_until_ready(daf_forward(x, residual, min_pallas_bytes=0))
    ref = x + residual
    assert y.shape == ref.shape and y.dtype == ref.dtype
    assert jnp.array_equal(y, ref), "mismatch vs reference (small forced-kernel path)"

    # 2) Default path with a multi-block grid (8 MiB f32 per operand).
    xb = jax.random.normal(k3, (4, 32, 128, 128), dtype=jnp.float32)
    rb = jax.random.normal(k4, (4, 32, 128, 128), dtype=jnp.float32)
    yb = jax.block_until_ready(daf_forward(xb, rb))
    assert jnp.array_equal(yb, xb + rb), "mismatch vs reference (multi-block path)"

    # 3) Ragged / tiny tensor -> plain-add fallback path.
    xr = jax.random.normal(k5, (2, 3, 5, 7), dtype=jnp.float32)
    rr = jax.random.normal(k6, (2, 3, 5, 7), dtype=jnp.float32)
    yr = jax.block_until_ready(daf_forward(xr, rr))
    assert jnp.array_equal(yr, xr + rr), "mismatch vs reference (fallback path)"

    print("KERNEL_OK")
</pallas_src>

<mosaic_0001>
module attributes {stable_mosaic.version = 11 : i64} {
  func.func @_add_kernel(%arg0: i32, %arg1: memref<16x128xf32, #tpu.memory_space<vmem>>, %arg2: memref<16x128xf32, #tpu.memory_space<vmem>>, %arg3: memref<16x128xf32, #tpu.memory_space<vmem>>) attributes {dimension_semantics = [#tpu.dimension_semantics<parallel>], iteration_bounds = array<i64: 1>, scalar_prefetch = 0 : i64, scratch_operands = 0 : i64, tpu.core_type = #tpu.core_type<tc>, window_params = [{transform_indices = @transform_0, window_bounds = array<i64: 16, 128>}, {transform_indices = @transform_1, window_bounds = array<i64: 16, 128>}, {transform_indices = @transform_2, window_bounds = array<i64: 16, 128>}]} {
    %c0 = arith.constant 0 : index
    %c0_0 = arith.constant 0 : index
    %0 = vector.load %arg1[%c0, %c0_0] : memref<16x128xf32, #tpu.memory_space<vmem>>, vector<16x128xf32>
    %c0_1 = arith.constant 0 : index
    %c0_2 = arith.constant 0 : index
    %1 = vector.load %arg2[%c0_1, %c0_2] : memref<16x128xf32, #tpu.memory_space<vmem>>, vector<16x128xf32>
    %2 = arith.addf %0, %1 : vector<16x128xf32>
    %c0_3 = arith.constant 0 : index
    %c0_4 = arith.constant 0 : index
    %3 = vector.load %arg3[%c0_3, %c0_4] : memref<16x128xf32, #tpu.memory_space<vmem>>, vector<16x128xf32>
    tpu.vector_store %arg3[%c0_3, %c0_4], %2 {strides = array<i32>} : memref<16x128xf32, #tpu.memory_space<vmem>>, vector<16x128xf32>,
    return
  }
  func.func @transform_0(%arg0: i32) -> (i32, i32) {
    %c0_i32 = arith.constant 0 : i32
    %c0_i32_0 = arith.constant 0 : i32
    return %arg0, %c0_i32 : i32, i32
  }
  func.func @transform_1(%arg0: i32) -> (i32, i32) {
    %c0_i32 = arith.constant 0 : i32
    %c0_i32_0 = arith.constant 0 : i32
    return %arg0, %c0_i32 : i32, i32
  }
  func.func @transform_2(%arg0: i32) -> (i32, i32) {
    %c0_i32 = arith.constant 0 : i32
    %c0_i32_0 = arith.constant 0 : i32
    return %arg0, %c0_i32 : i32, i32
  }
}

</mosaic_0001>

<bundles_post_ra>
// kernel: tpu_custom_call.1
= control target key start
LH: loop header
LB: loop body
LE: loop exit
PB: predicated region body
PF: predicated region fallthrough
CT: control target
= control target key end

     0   :  { %7 = vsyncpa [#allocation3], 0  ;;  %s184_s0 = inlined_call_operand.hbm [shape: f32[16,128], index: 0, kind: input, shape index: {}]   ;;  %s185_s1 = inlined_call_operand.hbm [shape: f32[16,128], index: 1, kind: input, shape index: {}]   ;;  %s186_s2 = inlined_call_operand.hbm [shape: f32[16,128], index: 2, kind: output, shape index: {}]  }
   0x1   :  { %8 = vsyncpa [#allocation6], 0 }
   0x2   :  { %9 = vsyncpa [#allocation4], 0  ;;  %s14_s11 = sshll.u32 %s184_s0, 4  ;;  %s155_s12 = smov [#allocation2]   ;;  %s15_s11 = int_to_ptr.hbm [resolvable:$true] %s14_s11 }
   0x3   :  { %s16_s13 = sshll.u32 %s155_s12, 4  ;;  %s27_s16 = sshll.u32 %s185_s1, 4  ;;  %s17_s13 = int_to_ptr.vmem [resolvable:$true] %s16_s13  ;;  %s28_s16 = int_to_ptr.hbm [resolvable:$true] %s27_s16 }
   0x4   :  { %s156_s17 = smov 128   ;;  %s157_s18 = smov 8  }
   0x5   :  { %22 = dma.hbm_to_vmem [thread:$0]  %s15_s11, 256, %s17_s13, [#allocation3], %s156_s17, %s156_s17, %s157_s18  }
   0x6   :  { %s158_s19 = smov [#allocation5]  }
   0x7   :  { %s29_s20 = sshll.u32 %s158_s19, 4  ;;  %s30_s20 = int_to_ptr.vmem [resolvable:$true] %s29_s20 }
   0x8   :  { %35 = dma.hbm_to_vmem [thread:$0]  %s28_s16, 256, %s30_s20, [#allocation6], %s156_s17, %s156_s17, %s157_s18  }
   0x9   :  { %149 = dma.done.wait [#allocation3], 256  }
   0xa   :  { %150 = vsyncadd [#allocation3], 4294967040 }
   0xb   :  { %151 = dma.done.wait [#allocation6], 256  }
   0xc   :  { %152 = vsyncadd [#allocation6], 4294967040  ;;  %s159_s0 = smov [#allocation7]   ;;  %s58_s24 = sshll.u32 %s186_s2, 4  ;;  %v44_v0 = vld [vmem:[#allocation2] sm:$0xff]  ;;  %v46_v1 = vld [vmem:[#allocation5] sm:$0xff]  ;;  %s59_s24 = int_to_ptr.hbm [resolvable:$true] %s58_s24 }
   0xd   :  { %s56_s21 = sshll.u32 %s159_s0, 4  ;;  %v45_v2 = vld [vmem:[#allocation2 + $0x8] sm:$0xff]  ;;  %v48_v3 = vadd.f32 %v46_v1, %v44_v0  ;;  %v47_v4 = vld [vmem:[#allocation5 + $0x8] sm:$0xff]  ;;  %s57_s21 = int_to_ptr.vmem [resolvable:$true] %s56_s21 }
   0xe   :  { %v49_v5 = vadd.f32 %v47_v4, %v45_v2 }
   0xf   :  { %50 = vst [vmem:[#allocation7] sm:$0xff] %v48_v3 }
  0x10   :  { %51 = vst [vmem:[#allocation7 + $0x8] sm:$0xff] %v49_v5 }
  0x11   :  { %64 = dma.vmem_to_hbm [thread:$0]  %s57_s21, 256, %s59_s24, [#allocation4], %s156_s17, %s156_s17, %s157_s18  }
  0x12   :  { %153 = dma.done.wait [#allocation4], 256  }
  0x13   :  { %154 = vsyncadd [#allocation4], 4294967040 }
  0x14   :  { %69 = vsyncpa [#allocation3], 1 }
  0x15   :  { %70 = vsyncpa [#allocation6], 1 }
  0x16   :  { %71 = vsyncpa [#allocation4], 1 }

</bundles_post_ra>
